<compile_context>
chip_gen: v7x
topology: tpu7x:2x2x1
jax: 0.10.0
libtpu: 0.0.40
codegen_flags: <defaults>
</compile_context>

<pallas_src>
import jax
import jax.numpy as jnp
import numpy as np
from jax.experimental import pallas as pl
from jax.experimental.pallas import tpu as pltpu

BN_EPS = 1e-5
FP = 128          # padded (lane-dense) feature width


def _round_up(n, m):
    return ((n + m - 1) // m) * m


def _softplus_stable(v):
    # branch-free, numerically stable; equals torch.nn.functional.softplus to f32 eps
    return jnp.maximum(v, 0.0) + jnp.log1p(jnp.exp(-jnp.abs(v)))


def cond_model_kernel(xy_ref, w1_ref, cst_ref, out_ref):
    """xy_ref:(bm,KP) [x|y|onehot|0-pad]; w1_ref:(KP,5*FP) block-diagonal stage-1 weight;
    cst_ref:(3*FP+8, FP) [w2; w3; w4_pad; 8 bias rows]; out_ref:(bm, FP)."""
    fp = out_ref.shape[1]                 # 128
    nb = cst_ref.shape[0] - 8             # first bias row

    # Stage 1: one MXU push -> [enc(x) | lin1(y) | g1 | g2 | g3], all 128-lane aligned.
    s1 = jnp.dot(xy_ref[...], w1_ref[...], preferred_element_type=jnp.float32)

    xin = s1[:, 0 * fp:1 * fp] + cst_ref[nb + 0:nb + 1, :]   # BN0 folded encoder
    y1 = s1[:, 1 * fp:2 * fp] + cst_ref[nb + 1:nb + 2, :]    # lin1 pre-gate
    g1 = s1[:, 2 * fp:3 * fp]                                # emb1[t] * BN1 scale
    g2 = s1[:, 3 * fp:4 * fp]
    g3 = s1[:, 4 * fp:5 * fp]

    # layer 1: gate, BN1 shift, softplus, multiply by encoded x
    yv = xin * _softplus_stable(g1 * y1 + cst_ref[nb + 2:nb + 3, :])

    # layer 2
    yv = _softplus_stable(
        g2 * (jnp.dot(yv, cst_ref[0:fp, :], preferred_element_type=jnp.float32)
              + cst_ref[nb + 3:nb + 4, :])
        + cst_ref[nb + 4:nb + 5, :])

    # layer 3
    yv = _softplus_stable(
        g3 * (jnp.dot(yv, cst_ref[fp:2 * fp, :], preferred_element_type=jnp.float32)
              + cst_ref[nb + 5:nb + 6, :])
        + cst_ref[nb + 6:nb + 7, :])

    # lin4 (weight padded to 128 lanes) -> lane-dense store; real cols [:C] sliced in wrapper
    out_ref[...] = (jnp.dot(yv, cst_ref[2 * fp:3 * fp, :],
                            preferred_element_type=jnp.float32)
                    + cst_ref[nb + 7:nb + 8, :])


def pack_params(params):
    """Fold eval-mode BatchNorms and pack everything into two constant slabs."""
    bn = params["bn"]                           # (16, F): 4 x (gamma, beta, mean, var)
    D = params["enc_w"].shape[0]                # data_dim
    F = params["enc_w"].shape[1]                # feature_dim
    Cin = params["lin1_w"].shape[0]             # y_dim (lin1 input)
    C = params["lin4_w"].shape[1]               # num_classes
    T = params["emb1"].shape[0]                 # n_steps

    assert F <= FP, f"feature_dim {F} > padded width {FP}"
    assert C <= FP, f"num_classes {C} > padded width {FP}"

    kin = D + Cin + T
    KP = max(128, _round_up(kin, 8))

    def fold(i):
        g, b, m, v = bn[4 * i], bn[4 * i + 1], bn[4 * i + 2], bn[4 * i + 3]
        s = g / jnp.sqrt(v + BN_EPS)
        c = b - m * s
        return s, c

    s0, c0 = fold(0)
    s1, c1 = fold(1)
    s2, c2 = fold(2)
    s3, c3 = fold(3)

    # Block-diagonal stage-1 weight:
    #   [x | y | onehot] @ W -> [enc(x)' | lin1(y) | g1' | g2' | g3']  (5 x 128 lanes)
    w1 = jnp.zeros((KP, 5 * FP), jnp.float32)
    w1 = w1.at[0:D, 0:F].set(params["enc_w"] * s0[None, :])                   # BN0 scale folded
    w1 = w1.at[D:D + Cin, FP:FP + F].set(params["lin1_w"])
    w1 = w1.at[D + Cin:D + Cin + T, 2 * FP:2 * FP + F].set(params["emb1"] * s1[None, :])
    w1 = w1.at[D + Cin:D + Cin + T, 3 * FP:3 * FP + F].set(params["emb2"] * s2[None, :])
    w1 = w1.at[D + Cin:D + Cin + T, 4 * FP:4 * FP + F].set(params["emb3"] * s3[None, :])

    # Constant slab: w2 | w3 | w4 (all padded to 128x128) followed by 8 bias rows.
    nb = 3 * FP
    cst = jnp.zeros((nb + 8, FP), jnp.float32)
    cst = cst.at[0:F, 0:F].set(params["lin2_w"])
    cst = cst.at[FP:FP + F, 0:F].set(params["lin3_w"])
    cst = cst.at[2 * FP:2 * FP + F, 0:C].set(params["lin4_w"])
    cst = cst.at[nb + 0, 0:F].set((params["enc_b"] * s0[None, :] + c0[None, :])[0])  # BN0 folded
    cst = cst.at[nb + 1, 0:F].set(params["lin1_b"][0])
    cst = cst.at[nb + 2, 0:F].set(c1)
    cst = cst.at[nb + 3, 0:F].set(params["lin2_b"][0])
    cst = cst.at[nb + 4, 0:F].set(c2)
    cst = cst.at[nb + 5, 0:F].set(params["lin3_b"][0])
    cst = cst.at[nb + 6, 0:F].set(c3)
    cst = cst.at[nb + 7, 0:C].set(params["lin4_b"][0])

    return dict(w_stage1=w1, const_slab=cst,
                data_dim=D, y_dim=Cin, num_classes=C, n_steps=T, feature_dim=F)


def new_conditional_model_forward(packed, x, y, t, yhat):
    """Returns (noise_estimation, classification_logits) like
    NewConditionalModel.forward with include_classifier=False."""
    if yhat is None:
        raise ValueError("yhat is None")
    B = x.shape[0]
    C = int(packed["num_classes"])
    T = int(packed["n_steps"])
    w1 = packed["w_stage1"]
    cst = packed["const_slab"]
    KP = w1.shape[0]

    # NOTE: t outside [0, n_steps) silently yields zero gates here, whereas
    # PyTorch nn.Embedding would raise; callers must pass valid timesteps.
    onehot = jax.nn.one_hot(t, T, dtype=jnp.float32)                       # (B, T)
    xy = jnp.concatenate([x.astype(jnp.float32), y.astype(jnp.float32), onehot], axis=1)
    kin = xy.shape[1]
    assert kin <= KP, f"input width {kin} exceeds packed K {KP}"

    # batch block: one sublane group minimum; large batches split across TCs (v7x).
    bm = min(128, _round_up(B, 8))
    BP = _round_up(B, bm)
    xy = jnp.pad(xy, ((0, BP - B), (0, KP - kin)))                          # (BP, KP)

    out = pl.pallas_call(
        cond_model_kernel,
        out_shape=jax.ShapeDtypeStruct((BP, FP), jnp.float32),
        grid_spec=pltpu.PrefetchScalarGridSpec(
            num_scalar_prefetch=0,
            grid=(BP // bm,),
            in_specs=[
                pl.BlockSpec((bm, KP), lambda i: (i, 0)),        # activations: per batch block
                pl.BlockSpec(w1.shape, lambda i: (0, 0)),        # weights stay resident
                pl.BlockSpec(cst.shape, lambda i: (0, 0)),
            ],
            out_specs=pl.BlockSpec((bm, FP), lambda i: (i, 0)),
        ),
        compiler_params=pltpu.CompilerParams(
            dimension_semantics=("parallel",)),
    )(xy, w1, cst)

    noise = out[:B, :C]                                    # drop lane/batch padding
    classification_logits = jnp.zeros_like(yhat)           # include_classifier=False branch
    return noise, classification_logits


# ----------------------------- reference (plain JAX, unfolded) -----------------------------
def _softplus_ref(v):
    # matches torch.nn.functional.softplus (beta=1, threshold=20)
    return jnp.where(v > 20.0, v, jnp.log1p(jnp.exp(jnp.minimum(v, 20.0))))


def ref_forward(params, x, y, t, yhat):
    def bn(v, idx):
        g = params["bn"][4 * idx + 0]
        b = params["bn"][4 * idx + 1]
        m = params["bn"][4 * idx + 2]
        var = params["bn"][4 * idx + 3]
        return (v - m) / jnp.sqrt(var + BN_EPS) * g + b

    xe = bn(x @ params["enc_w"] + params["enc_b"], 0)
    yv = params["emb1"][t] * (y @ params["lin1_w"] + params["lin1_b"])
    yv = _softplus_ref(bn(yv, 1))
    yv = xe * yv
    yv = params["emb2"][t] * (yv @ params["lin2_w"] + params["lin2_b"])
    yv = _softplus_ref(bn(yv, 2))
    yv = params["emb3"][t] * (yv @ params["lin3_w"] + params["lin3_b"])
    yv = _softplus_ref(bn(yv, 3))
    noise = yv @ params["lin4_w"] + params["lin4_b"]
    return noise, jnp.zeros_like(yhat)


# ----------------------------- deterministic init -----------------------------
def init_params(key, data_dim, feature_dim, y_dim, n_steps):
    ks = jax.random.split(key, 10)

    def linear(k, fin, fout):
        kw, kb = jax.random.split(k)
        bound = 1.0 / np.sqrt(fin)
        w = jax.random.uniform(kw, (fin, fout), jnp.float32, -bound, bound)
        b = jax.random.uniform(kb, (1, fout), jnp.float32, -bound, bound)
        return w, b

    enc_w, enc_b = linear(ks[0], data_dim, feature_dim)
    lin1_w, lin1_b = linear(ks[1], y_dim, feature_dim)
    lin2_w, lin2_b = linear(ks[2], feature_dim, feature_dim)
    lin3_w, lin3_b = linear(ks[3], feature_dim, feature_dim)
    lin4_w, lin4_b = linear(ks[4], feature_dim, y_dim)
    # nn.Embedding weights with .uniform_() -> U[0, 1)
    emb1 = jax.random.uniform(ks[5], (n_steps, feature_dim), jnp.float32)
    emb2 = jax.random.uniform(ks[6], (n_steps, feature_dim), jnp.float32)
    emb3 = jax.random.uniform(ks[7], (n_steps, feature_dim), jnp.float32)

    # BatchNorm eval stats. Fresh PyTorch modules would be gamma=1, beta=0,
    # mean=0, var=1; use non-trivial values here to actually exercise the fold.
    kbn1, kbn2 = jax.random.split(ks[8])
    gammas = jax.random.uniform(kbn1, (4, feature_dim), jnp.float32, 0.5, 1.5)
    betas = 0.1 * jax.random.normal(kbn2, (4, feature_dim), jnp.float32)
    kbn3, kbn4 = jax.random.split(ks[9])
    means = 0.1 * jax.random.normal(kbn3, (4, feature_dim), jnp.float32)
    varis = jax.random.uniform(kbn4, (4, feature_dim), jnp.float32, 0.5, 1.5)
    bn = jnp.concatenate([jnp.stack([gammas[i], betas[i], means[i], varis[i]])
                          for i in range(4)], axis=0).astype(jnp.float32)  # (16, F)

    return dict(enc_w=enc_w, enc_b=enc_b, bn=bn,
                lin1_w=lin1_w, lin1_b=lin1_b, emb1=emb1,
                lin2_w=lin2_w, lin2_b=lin2_b, emb2=emb2,
                lin3_w=lin3_w, lin3_b=lin3_b, emb3=emb3,
                lin4_w=lin4_w, lin4_b=lin4_b)


if __name__ == "__main__":
    B, DATA_DIM, FEATURE_DIM, Y_DIM = 8, 32, 64, 10
    TIMESTEPS = 10
    N_STEPS = TIMESTEPS + 1          # config.diffusion.timesteps + 1

    key = jax.random.PRNGKey(0)
    kx, ky, kt, kyh, kp = jax.random.split(key, 5)

    x = jax.random.normal(kx, (B, DATA_DIM), jnp.float32)
    y = jax.random.normal(ky, (B, Y_DIM), jnp.float32)
    t = jax.random.randint(kt, (B,), 0, N_STEPS, jnp.int32)
    yhat = jax.random.normal(kyh, (B, Y_DIM), jnp.float32)

    params = init_params(kp, DATA_DIM, FEATURE_DIM, Y_DIM, N_STEPS)
    packed = pack_params(params)
    packed = {k: (jax.block_until_ready(v) if isinstance(v, jnp.ndarray) else v)
              for k, v in packed.items()}

    noise, logits = new_conditional_model_forward(packed, x, y, t, yhat)
    noise = jax.block_until_ready(noise)
    logits = jax.block_until_ready(logits)

    ref_noise, ref_logits = ref_forward(params, x, y, t, yhat)
    np.testing.assert_allclose(np.asarray(noise), np.asarray(ref_noise),
                               rtol=1e-4, atol=1e-4)
    np.testing.assert_allclose(np.asarray(logits), np.asarray(ref_logits),
                               rtol=0, atol=0)

    print("KERNEL_OK")
</pallas_src>

<mosaic_0001>
module attributes {stable_mosaic.version = 11 : i64} {
  func.func @cond_model_kernel(%arg0: i32, %arg1: memref<8x128xf32, #tpu.memory_space<vmem>>, %arg2: memref<128x640xf32, #tpu.memory_space<vmem>>, %arg3: memref<392x128xf32, #tpu.memory_space<vmem>>, %arg4: memref<8x128xf32, #tpu.memory_space<vmem>>) attributes {dimension_semantics = [#tpu.dimension_semantics<parallel>], iteration_bounds = array<i64: 1>, scalar_prefetch = 0 : i64, scratch_operands = 0 : i64, tpu.core_type = #tpu.core_type<tc>, window_params = [{transform_indices = @transform_0, window_bounds = array<i64: 8, 128>}, {pipeline_mode = #tpu.pipeline_mode<synchronous>, transform_indices = @transform_1, window_bounds = array<i64: 128, 640>}, {pipeline_mode = #tpu.pipeline_mode<synchronous>, transform_indices = @transform_2, window_bounds = array<i64: 392, 128>}, {transform_indices = @transform_3, window_bounds = array<i64: 8, 128>}]} {
    %c0 = arith.constant 0 : index
    %c0_0 = arith.constant 0 : index
    %0 = vector.load %arg1[%c0, %c0_0] : memref<8x128xf32, #tpu.memory_space<vmem>>, vector<8x128xf32>
    %c0_1 = arith.constant 0 : index
    %c0_2 = arith.constant 0 : index
    %1 = vector.load %arg2[%c0_1, %c0_2] : memref<128x640xf32, #tpu.memory_space<vmem>>, vector<128x640xf32>
    %cst = arith.constant dense<0.000000e+00> : vector<8x640xf32>
    %2 = tpu.matmul %0, %1, %cst {dimension_numbers = #tpu.dot_dimension_numbers<[1], [0], [0], [1], [0, 0, 1, 1], [], []>} : vector<8x128xf32>, vector<128x640xf32>, vector<8x640xf32> -> vector<8x640xf32>
    %3 = vector.extract_strided_slice %2 {offsets = [0, 0], sizes = [8, 128], strides = [1, 1]} : vector<8x640xf32> to vector<8x128xf32>
    %c384 = arith.constant 384 : index
    %c0_3 = arith.constant 0 : index
    %4 = vector.load %arg3[%c384, %c0_3] : memref<392x128xf32, #tpu.memory_space<vmem>>, vector<1x128xf32>
    %5 = vector.broadcast %4 : vector<1x128xf32> to vector<8x128xf32>
    %6 = arith.addf %3, %5 : vector<8x128xf32>
    %7 = vector.extract_strided_slice %2 {offsets = [0, 128], sizes = [8, 128], strides = [1, 1]} : vector<8x640xf32> to vector<8x128xf32>
    %c385 = arith.constant 385 : index
    %c0_4 = arith.constant 0 : index
    %8 = vector.load %arg3[%c385, %c0_4] : memref<392x128xf32, #tpu.memory_space<vmem>>, vector<1x128xf32>
    %9 = vector.broadcast %8 : vector<1x128xf32> to vector<8x128xf32>
    %10 = arith.addf %7, %9 : vector<8x128xf32>
    %11 = vector.extract_strided_slice %2 {offsets = [0, 256], sizes = [8, 128], strides = [1, 1]} : vector<8x640xf32> to vector<8x128xf32>
    %12 = vector.extract_strided_slice %2 {offsets = [0, 384], sizes = [8, 128], strides = [1, 1]} : vector<8x640xf32> to vector<8x128xf32>
    %13 = vector.extract_strided_slice %2 {offsets = [0, 512], sizes = [8, 128], strides = [1, 1]} : vector<8x640xf32> to vector<8x128xf32>
    %14 = arith.mulf %11, %10 : vector<8x128xf32>
    %c386 = arith.constant 386 : index
    %c0_5 = arith.constant 0 : index
    %15 = vector.load %arg3[%c386, %c0_5] : memref<392x128xf32, #tpu.memory_space<vmem>>, vector<1x128xf32>
    %16 = vector.broadcast %15 : vector<1x128xf32> to vector<8x128xf32>
    %17 = arith.addf %14, %16 : vector<8x128xf32>
    %cst_6 = arith.constant 0.000000e+00 : f32
    %18 = vector.broadcast %cst_6 : f32 to vector<8x128xf32>
    %19 = arith.maximumf %17, %18 : vector<8x128xf32>
    %20 = math.absf %17 : vector<8x128xf32>
    %cst_7 = arith.constant 0.000000e+00 : f32
    %21 = vector.broadcast %cst_7 : f32 to vector<8x128xf32>
    %22 = arith.subf %21, %20 : vector<8x128xf32>
    %23 = math.exp %22 : vector<8x128xf32>
    %24 = math.log1p %23 : vector<8x128xf32>
    %25 = arith.addf %19, %24 : vector<8x128xf32>
    %26 = arith.mulf %6, %25 : vector<8x128xf32>
    %c0_8 = arith.constant 0 : index
    %c0_9 = arith.constant 0 : index
    %27 = vector.load %arg3[%c0_8, %c0_9] : memref<392x128xf32, #tpu.memory_space<vmem>>, vector<128x128xf32>
    %cst_10 = arith.constant dense<0.000000e+00> : vector<8x128xf32>
    %28 = tpu.matmul %26, %27, %cst_10 {dimension_numbers = #tpu.dot_dimension_numbers<[1], [0], [0], [1], [0, 0, 1, 1], [], []>} : vector<8x128xf32>, vector<128x128xf32>, vector<8x128xf32> -> vector<8x128xf32>
    %c387 = arith.constant 387 : index
    %c0_11 = arith.constant 0 : index
    %29 = vector.load %arg3[%c387, %c0_11] : memref<392x128xf32, #tpu.memory_space<vmem>>, vector<1x128xf32>
    %30 = vector.broadcast %29 : vector<1x128xf32> to vector<8x128xf32>
    %31 = arith.addf %28, %30 : vector<8x128xf32>
    %32 = arith.mulf %12, %31 : vector<8x128xf32>
    %c388 = arith.constant 388 : index
    %c0_12 = arith.constant 0 : index
    %33 = vector.load %arg3[%c388, %c0_12] : memref<392x128xf32, #tpu.memory_space<vmem>>, vector<1x128xf32>
    %34 = vector.broadcast %33 : vector<1x128xf32> to vector<8x128xf32>
    %35 = arith.addf %32, %34 : vector<8x128xf32>
    %cst_13 = arith.constant 0.000000e+00 : f32
    %36 = vector.broadcast %cst_13 : f32 to vector<8x128xf32>
    %37 = arith.maximumf %35, %36 : vector<8x128xf32>
    %38 = math.absf %35 : vector<8x128xf32>
    %cst_14 = arith.constant 0.000000e+00 : f32
    %39 = vector.broadcast %cst_14 : f32 to vector<8x128xf32>
    %40 = arith.subf %39, %38 : vector<8x128xf32>
    %41 = math.exp %40 : vector<8x128xf32>
    %42 = math.log1p %41 : vector<8x128xf32>
    %43 = arith.addf %37, %42 : vector<8x128xf32>
    %c128 = arith.constant 128 : index
    %c0_15 = arith.constant 0 : index
    %44 = vector.load %arg3[%c128, %c0_15] : memref<392x128xf32, #tpu.memory_space<vmem>>, vector<128x128xf32>
    %cst_16 = arith.constant dense<0.000000e+00> : vector<8x128xf32>
    %45 = tpu.matmul %43, %44, %cst_16 {dimension_numbers = #tpu.dot_dimension_numbers<[1], [0], [0], [1], [0, 0, 1, 1], [], []>} : vector<8x128xf32>, vector<128x128xf32>, vector<8x128xf32> -> vector<8x128xf32>
    %c389 = arith.constant 389 : index
    %c0_17 = arith.constant 0 : index
    %46 = vector.load %arg3[%c389, %c0_17] : memref<392x128xf32, #tpu.memory_space<vmem>>, vector<1x128xf32>
    %47 = vector.broadcast %46 : vector<1x128xf32> to vector<8x128xf32>
    %48 = arith.addf %45, %47 : vector<8x128xf32>
    %49 = arith.mulf %13, %48 : vector<8x128xf32>
    %c390 = arith.constant 390 : index
    %c0_18 = arith.constant 0 : index
    %50 = vector.load %arg3[%c390, %c0_18] : memref<392x128xf32, #tpu.memory_space<vmem>>, vector<1x128xf32>
    %51 = vector.broadcast %50 : vector<1x128xf32> to vector<8x128xf32>
    %52 = arith.addf %49, %51 : vector<8x128xf32>
    %cst_19 = arith.constant 0.000000e+00 : f32
    %53 = vector.broadcast %cst_19 : f32 to vector<8x128xf32>
    %54 = arith.maximumf %52, %53 : vector<8x128xf32>
    %55 = math.absf %52 : vector<8x128xf32>
    %cst_20 = arith.constant 0.000000e+00 : f32
    %56 = vector.broadcast %cst_20 : f32 to vector<8x128xf32>
    %57 = arith.subf %56, %55 : vector<8x128xf32>
    %58 = math.exp %57 : vector<8x128xf32>
    %59 = math.log1p %58 : vector<8x128xf32>
    %60 = arith.addf %54, %59 : vector<8x128xf32>
    %c256 = arith.constant 256 : index
    %c0_21 = arith.constant 0 : index
    %61 = vector.load %arg3[%c256, %c0_21] : memref<392x128xf32, #tpu.memory_space<vmem>>, vector<128x128xf32>
    %cst_22 = arith.constant dense<0.000000e+00> : vector<8x128xf32>
    %62 = tpu.matmul %60, %61, %cst_22 {dimension_numbers = #tpu.dot_dimension_numbers<[1], [0], [0], [1], [0, 0, 1, 1], [], []>} : vector<8x128xf32>, vector<128x128xf32>, vector<8x128xf32> -> vector<8x128xf32>
    %c391 = arith.constant 391 : index
    %c0_23 = arith.constant 0 : index
    %63 = vector.load %arg3[%c391, %c0_23] : memref<392x128xf32, #tpu.memory_space<vmem>>, vector<1x128xf32>
    %64 = vector.broadcast %63 : vector<1x128xf32> to vector<8x128xf32>
    %65 = arith.addf %62, %64 : vector<8x128xf32>
    %c0_24 = arith.constant 0 : index
    %c0_25 = arith.constant 0 : index
    %66 = vector.load %arg4[%c0_24, %c0_25] : memref<8x128xf32, #tpu.memory_space<vmem>>, vector<8x128xf32>
    tpu.vector_store %arg4[%c0_24, %c0_25], %65 {strides = array<i32>} : memref<8x128xf32, #tpu.memory_space<vmem>>, vector<8x128xf32>,
    return
  }
  func.func @transform_0(%arg0: i32) -> (i32, i32) {
    %c0_i32 = arith.constant 0 : i32
    %c0_i32_0 = arith.constant 0 : i32
    return %arg0, %c0_i32 : i32, i32
  }
  func.func @transform_1(%arg0: i32) -> (i32, i32) {
    %c0_i32 = arith.constant 0 : i32
    %c0_i32_0 = arith.constant 0 : i32
    %c0_i32_1 = arith.constant 0 : i32
    return %c0_i32, %c0_i32_0 : i32, i32
  }
  func.func @transform_2(%arg0: i32) -> (i32, i32) {
    %c0_i32 = arith.constant 0 : i32
    %c0_i32_0 = arith.constant 0 : i32
    %c0_i32_1 = arith.constant 0 : i32
    return %c0_i32, %c0_i32_0 : i32, i32
  }
  func.func @transform_3(%arg0: i32) -> (i32, i32) {
    %c0_i32 = arith.constant 0 : i32
    %c0_i32_0 = arith.constant 0 : i32
    return %arg0, %c0_i32 : i32, i32
  }
}

</mosaic_0001>

<bundles_post_ra>
// kernel: tpu_custom_call.1
= control target key start
LH: loop header
LB: loop body
LE: loop exit
PB: predicated region body
PF: predicated region fallthrough
CT: control target
= control target key end

     0   :  { %8 = vsyncpa [#allocation3], 0  ;;  %s1338_s0 = inlined_call_operand.hbm [shape: f32[8,128], index: 0, kind: input, shape index: {}]   ;;  %s1339_s1 = inlined_call_operand.hbm [shape: f32[128,640], index: 1, kind: input, shape index: {}]   ;;  %s1340_s2 = inlined_call_operand.hbm [shape: f32[392,128], index: 2, kind: input, shape index: {}]   ;;  %s1341_s3 = inlined_call_operand.hbm [shape: f32[8,128], index: 3, kind: output, shape index: {}]  }
   0x1   :  { %9 = vsyncpa [#allocation6], 0 }
   0x2   :  { %10 = vsyncpa [#allocation4], 0  ;;  %s1209_s12 = smov [#allocation5]   ;;  %s1115_s16 = scalar_lea.hbm %s1339_s1, 10240 }
   0x3   :  { %s26_s13 = sshll.u32 %s1209_s12, 4  ;;  %p1116_p0 = scmp.ne.s32.totalorder %s1339_s1, %s1115_s16  ;;  %s27_s13 = int_to_ptr.vmem [resolvable:$true] %s26_s13 }
   0x4   :  { %p1119_p1 = scmp.lt.u32.totalorder %s1115_s16, %s1339_s1 }
   0x6   :  { %p1121_p2 = pnand %p1119_p1, %p1116_p0 }
   0x8   :  { %1124 = shalt.err (!%p1121_p2)
}
   0x9   :  { %s1125_s21 = scalar_lea.vmem %s27_s13, 10240  ;;  %p1130_p4 = scmp.lt.s32.totalorder %s27_s13, %s27_s13 }
   0xa   :  { %p1126_p3 = scmp.ne.s32.totalorder %s27_s13, %s1125_s21  ;;  %p1131_p5 = scmp.lt.s32.totalorder %s1125_s21, %s1125_s21 }
   0xc   :  { %p1132_p6 = por %p1131_p5, %p1130_p4 }
   0xe   :  { %p1133_p7 = pnand %p1132_p6, %p1126_p3 }
  0x10   :  { %1136 = shalt.err (!%p1133_p7)
}
  0x11   :  { %s1210_s22 = smov 640   ;;  %s1211_s23 = smov 40  }
  0x12   :  { %32 = dma.hbm_to_vmem [thread:$0]  %s1339_s1, 10240, %s27_s13, [#allocation6], %s1210_s22, %s1210_s22, %s1211_s23  }
  0x13   :  { %s1212_s26 = smov [#allocation2]   ;;  %s1213_s28 = smov [#allocation7]  }
  0x14   :  { %s17_s27 = sshll.u32 %s1212_s26, 4  ;;  %s38_s29 = sshll.u32 %s1213_s28, 4  ;;  %s18_s27 = int_to_ptr.vmem [resolvable:$true] %s17_s27  ;;  %s39_s29 = int_to_ptr.vmem [resolvable:$true] %s38_s29 }
  0x15   :  { %s1137_s5 = scalar_lea.hbm %s1338_s0, 128 }
  0x16   :  { %p1138_p8 = scmp.ne.s32.totalorder %s1338_s0, %s1137_s5  ;;  %p1141_p9 = scmp.lt.u32.totalorder %s1137_s5, %s1338_s0 }
  0x18   :  { %p1143_p10 = pnand %p1141_p9, %p1138_p8 }
  0x1a   :  { %1146 = shalt.err (!%p1143_p10)
}
  0x1b   :  { %s1147_s1 = scalar_lea.vmem %s18_s27, 128  ;;  %p1152_p12 = scmp.lt.s32.totalorder %s18_s27, %s18_s27 }
  0x1c   :  { %p1148_p11 = scmp.ne.s32.totalorder %s18_s27, %s1147_s1  ;;  %p1153_p13 = scmp.lt.s32.totalorder %s1147_s1, %s1147_s1 }
  0x1e   :  { %p1154_p0 = por %p1153_p13, %p1152_p12 }
  0x20   :  { %p1155_p1 = pnand %p1154_p0, %p1148_p11 }
  0x22   :  { %1158 = shalt.err (!%p1155_p1)
}
  0x23   :  { %20 = dma.hbm_to_vmem [thread:$0]  %s1338_s0, 128, %s18_s27, [#allocation3]  }
  0x24   :  { %s1159_s14 = scalar_lea.hbm %s1340_s2, 6272 }
  0x25   :  { %p1160_p2 = scmp.ne.s32.totalorder %s1340_s2, %s1159_s14  ;;  %p1163_p3 = scmp.lt.u32.totalorder %s1159_s14, %s1340_s2 }
  0x27   :  { %p1165_p4 = pnand %p1163_p3, %p1160_p2 }
  0x29   :  { %1168 = shalt.err (!%p1165_p4)
}
  0x2a   :  { %s1169_s19 = scalar_lea.vmem %s39_s29, 6272  ;;  %p1174_p6 = scmp.lt.s32.totalorder %s39_s29, %s39_s29 }
  0x2b   :  { %p1170_p5 = scmp.ne.s32.totalorder %s39_s29, %s1169_s19  ;;  %p1175_p7 = scmp.lt.s32.totalorder %s1169_s19, %s1169_s19 }
  0x2d   :  { %p1176_p8 = por %p1175_p7, %p1174_p6 }
  0x2f   :  { %p1177_p9 = pnand %p1176_p8, %p1170_p5 }
  0x31   :  { %1180 = shalt.err (!%p1177_p9)
}
  0x32   :  { %s1214_s0 = smov 128   ;;  %s1215_s20 = smov 8  }
  0x33   :  { %44 = dma.hbm_to_vmem [thread:$0]  %s1340_s2, 6272, %s39_s29, [#allocation6], %s1214_s0, %s1214_s0, %s1215_s20  }
  0x34   :  { %1203 = dma.done.wait [#allocation3], 128  }
  0x35   :  { %1204 = vsyncadd [#allocation3], 4294967168 }
  0x36   :  { %1205 = dma.done.wait [#allocation6], 16512  }
  0x37   :  { %1206 = vsyncadd [#allocation6], 4294950784  ;;  %v1216_v0 = vmov 0.0   ;;  %v56_v1 = vld [vmem:[#allocation5 + $0x8] sm:$0xff]  ;;  %v61_v2 = vld [vmem:[#allocation5 + $0x30] sm:$0xff]  ;;  %vm1218_vm0 = vmmov 0  }
  0x38   :  { %199 = vmatprep.mubr.f32.mxu0 %v1216_v0  ;;  %270 = vmatprep.mubr.f32.mxu1 %v1216_v0  ;;  %v55_v3 = vld [vmem:[#allocation5] sm:$0xff]  ;;  %v932_v4 = vpack.c.bf16 %v61_v2, %v56_v1  ;;  %v60_v5 = vld [vmem:[#allocation5 + $0x28] sm:$0xff]  ;;  %v58_v6 = vld [vmem:[#allocation5 + $0x18] sm:$0xff]  ;;  %s1219_s2 = smov [#allocation8]  }
  0x39   :  { %v63_v7 = vld [vmem:[#allocation5 + $0x40] sm:$0xff]  ;;  %v934_v8 = vpack.c.bf16 %v60_v5, %v55_v3  ;;  %v57_v10 = vld [vmem:[#allocation5 + $0x10] sm:$0xff]  ;;  %v62_v11 = vld [vmem:[#allocation5 + $0x38] sm:$0xff]  ;;  %s706_s23 = sshll.u32 %s1219_s2, 4  ;;  %s707_s23 = int_to_ptr.vmem [resolvable:$true] %s706_s23 }
  0x3a   :  { %v964_v9 = vpack.c.bf16 %v63_v7, %v58_v6  ;;  %v66_v12 = vld [vmem:[#allocation5 + $0x58] sm:$0xff]  ;;  %933 = vmatprep.subr.bf16.mxu0 %v932_v4  ;;  %v966_v13 = vpack.c.bf16 %v62_v11, %v57_v10  ;;  %v71_v14 = vld [vmem:[#allocation5 + $0x80] sm:$0xff]  ;;  %v65_v15 = vld [vmem:[#allocation5 + $0x50] sm:$0xff]  ;;  %s1181_s24 = scalar_lea.vmem %s707_s23, 128  ;;  %p1186_p11 = scmp.lt.s32.totalorder %s707_s23, %s707_s23 }
  0x3b   :  { %v70_v16 = vld [vmem:[#allocation5 + $0x78] sm:$0xff]  ;;  %935 = vmatpush1.bf16.msra.mxu0 %v934_v8  ;;  %v936_v17 = vpack.c.bf16 %v71_v14, %v66_v12  ;;  %v68_v19 = vld [vmem:[#allocation5 + $0x68] sm:$0xff]  ;;  %v73_v20 = vld [vmem:[#allocation5 + $0x90] sm:$0xff]  ;;  %p1182_p10 = scmp.ne.s32.totalorder %s707_s23, %s1181_s24  ;;  %p1187_p12 = scmp.lt.s32.totalorder %s1181_s24, %s1181_s24 }
  0x3c   :  { %965 = vmatprep.subr.bf16.mxu1 %v964_v9  ;;  %v938_v18 = vpack.c.bf16 %v70_v16, %v65_v15  ;;  %v67_v21 = vld [vmem:[#allocation5 + $0x60] sm:$0xff]  ;;  %v968_v22 = vpack.c.bf16 %v73_v20, %v68_v19  ;;  %v72_v23 = vld [vmem:[#allocation5 + $0x88] sm:$0xff]  ;;  %v81_v25 = vld [vmem:[#allocation5 + $0xd0] sm:$0xff] }
  0x3d   :  { %967 = vmatpush1.bf16.msra.mxu1 %v966_v13  ;;  %v76_v24 = vld [vmem:[#allocation5 + $0xa8] sm:$0xff]  ;;  %937 = vmatprep.subr.bf16.mxu0 %v936_v17  ;;  %v970_v26 = vpack.c.bf16 %v72_v23, %v67_v21  ;;  %v75_v28 = vld [vmem:[#allocation5 + $0xa0] sm:$0xff]  ;;  %v78_v30 = vld [vmem:[#allocation5 + $0xb8] sm:$0xff]  ;;  %p1188_p13 = por %p1187_p12, %p1186_p11 }
  0x3e   :  { %v940_v27 = vpack.c.bf16 %v81_v25, %v76_v24  ;;  %v80_v29 = vld [vmem:[#allocation5 + $0xc8] sm:$0xff]  ;;  %969 = vmatprep.subr.bf16.mxu1 %v968_v22  ;;  %v83_v31 = vld [vmem:[#allocation5 + $0xe0] sm:$0xff]  ;;  %v77_v32 = vld [vmem:[#allocation5 + $0xb0] sm:$0xff] }
  0x3f   :  { %v82_v33 = vld [vmem:[#allocation5 + $0xd8] sm:$0xff]  ;;  %939 = vmatpush1.bf16.msra.mxu0 %v938_v18  ;;  %v942_v34 = vpack.c.bf16 %v80_v29, %v75_v28  ;;  %v972_v35 = vpack.c.bf16 %v83_v31, %v78_v30  ;;  %v91_v37 = vld [vmem:[#allocation5 + $0x120] sm:$0xff]  ;;  %v85_v38 = vld [vmem:[#allocation5 + $0xf0] sm:$0xff]  ;;  %p1189_p0 = pnand %p1188_p13, %p1182_p10 }
  0x40   :  { %v86_v36 = vld [vmem:[#allocation5 + $0xf8] sm:$0xff]  ;;  %941 = vmatprep.subr.bf16.mxu0 %v940_v27  ;;  %v974_v39 = vpack.c.bf16 %v82_v33, %v77_v32  ;;  %v88_v42 = vld [vmem:[#allocation5 + $0x108] sm:$0xff]  ;;  %v93_v43 = vld [vmem:[#allocation5 + $0x130] sm:$0xff] }
  0x41   :  { %971 = vmatpush1.bf16.msra.mxu1 %v970_v26  ;;  %v944_v40 = vpack.c.bf16 %v91_v37, %v86_v36  ;;  %v90_v41 = vld [vmem:[#allocation5 + $0x118] sm:$0xff]  ;;  %v976_v44 = vpack.c.bf16 %v93_v43, %v88_v42  ;;  %v87_v45 = vld [vmem:[#allocation5 + $0x100] sm:$0xff]  ;;  %v92_v46 = vld [vmem:[#allocation5 + $0x128] sm:$0xff] }
  0x42   :  { %973 = vmatprep.subr.bf16.mxu1 %v972_v35  ;;  %v96_v47 = vld [vmem:[#allocation5 + $0x148] sm:$0xff]  ;;  %v101_v48 = vld [vmem:[#allocation5 + $0x170] sm:$0xff]  ;;  %v946_v49 = vpack.c.bf16 %v90_v41, %v85_v38  ;;  %v98_v50 = vld [vmem:[#allocation5 + $0x158] sm:$0xff]  ;;  %v978_v52 = vpack.c.bf16 %v92_v46, %v87_v45  ;;  %v1217_v38 = vmov 0.0|0.0  }
  0x43   :  { %943 = vmatpush1.bf16.msra.mxu0 %v942_v34  ;;  %v103_v51 = vld [vmem:[#allocation5 + $0x180] sm:$0xff]  ;;  %v948_v53 = vpack.c.bf16 %v101_v48, %v96_v47  ;;  %v100_v55 = vld [vmem:[#allocation5 + $0x168] sm:$0xff]  ;;  %v97_v56 = vld [vmem:[#allocation5 + $0x150] sm:$0xff] }
  0x44   :  { %945 = vmatprep.subr.bf16.mxu0 %v944_v40  ;;  %v95_v54 = vld [vmem:[#allocation5 + $0x140] sm:$0xff]  ;;  %v980_v57 = vpack.c.bf16 %v103_v51, %v98_v50  ;;  %v102_v58 = vld [vmem:[#allocation5 + $0x178] sm:$0xff]  ;;  %v108_v61 = vld [vmem:[#allocation5 + $0x1a8] sm:$0xff] }
  0x45   :  { %975 = vmatpush1.bf16.msra.mxu1 %v974_v39  ;;  %v106_v59 = vld [vmem:[#allocation5 + $0x198] sm:$0xff]  ;;  %v111_v60 = vld [vmem:[#allocation5 + $0x1c0] sm:$0xff]  ;;  %v113_v62 = vld [vmem:[#allocation5 + $0x1d0] sm:$0xff]  ;;  %v950_v63 = vpack.c.bf16 %v100_v55, %v95_v54  ;;  %v982_v1 = vpack.c.bf16 %v102_v58, %v97_v56 }
  0x46   :  { %977 = vmatprep.subr.bf16.mxu1 %v976_v44  ;;  %v952_v2 = vpack.c.bf16 %v111_v60, %v106_v59  ;;  %v105_v3 = vld [vmem:[#allocation5 + $0x190] sm:$0xff]  ;;  %v110_v4 = vld [vmem:[#allocation5 + $0x1b8] sm:$0xff]  ;;  %v107_v5 = vld [vmem:[#allocation5 + $0x1a0] sm:$0xff]  ;;  %v984_v6 = vpack.c.bf16 %v113_v62, %v108_v61 }
  0x47   :  { %947 = vmatpush1.bf16.msra.mxu0 %v946_v49  ;;  %v112_v7 = vld [vmem:[#allocation5 + $0x1c8] sm:$0xff]  ;;  %v121_v9 = vld [vmem:[#allocation5 + $0x210] sm:$0xff]  ;;  %v118_v10 = vld [vmem:[#allocation5 + $0x1f8] sm:$0xff]  ;;  %v954_v12 = vpack.c.bf16 %v110_v4, %v105_v3 }
  0x48   :  { %949 = vmatprep.subr.bf16.mxu0 %v948_v53  ;;  %v116_v8 = vld [vmem:[#allocation5 + $0x1e8] sm:$0xff]  ;;  %v123_v11 = vld [vmem:[#allocation5 + $0x220] sm:$0xff]  ;;  %v986_v13 = vpack.c.bf16 %v112_v7, %v107_v5  ;;  %v117_v17 = vld [vmem:[#allocation5 + $0x1f0] sm:$0xff] }
  0x49   :  { %979 = vmatpush1.bf16.msra.mxu1 %v978_v52  ;;  %v956_v14 = vpack.c.bf16 %v121_v9, %v116_v8  ;;  %v115_v15 = vld [vmem:[#allocation5 + $0x1e0] sm:$0xff]  ;;  %v120_v16 = vld [vmem:[#allocation5 + $0x208] sm:$0xff]  ;;  %v988_v18 = vpack.c.bf16 %v123_v11, %v118_v10  ;;  %v122_v19 = vld [vmem:[#allocation5 + $0x218] sm:$0xff] }
  0x4a   :  { %981 = vmatprep.subr.bf16.mxu1 %v980_v57  ;;  %v126_v20 = vld [vmem:[#allocation5 + $0x238] sm:$0xff]  ;;  %v131_v21 = vld [vmem:[#allocation5 + $0x260] sm:$0xff]  ;;  %v128_v22 = vld [vmem:[#allocation5 + $0x248] sm:$0xff]  ;;  %v958_v24 = vpack.c.bf16 %v120_v16, %v115_v15  ;;  %v990_v25 = vpack.c.bf16 %v122_v19, %v117_v17 }
  0x4b   :  { %951 = vmatpush1.bf16.msra.mxu0 %v950_v63  ;;  %v133_v23 = vld [vmem:[#allocation5 + $0x270] sm:$0xff]  ;;  %v960_v26 = vpack.c.bf16 %v131_v21, %v126_v20  ;;  %v130_v28 = vld [vmem:[#allocation5 + $0x258] sm:$0xff]  ;;  %v127_v30 = vld [vmem:[#allocation5 + $0x240] sm:$0xff] }
  0x4c   :  { %953 = vmatprep.subr.bf16.mxu0 %v952_v2  ;;  %v125_v27 = vld [vmem:[#allocation5 + $0x230] sm:$0xff]  ;;  %v992_v29 = vpack.c.bf16 %v133_v23, %v128_v22  ;;  %v132_v31 = vld [vmem:[#allocation5 + $0x268] sm:$0xff]  ;;  %v1278_v34 = vld [vmem:[#allocation2] sm:$0xff] }
  0x4d   :  { %983 = vmatpush1.bf16.msra.mxu1 %v982_v1  ;;  %v962_v32 = vpack.c.bf16 %v130_v28, %v125_v27  ;;  %v994_v33 = vpack.c.bf16 %v132_v31, %v127_v30  ;;  %v382_v35 = vld [vmem:[#allocation7] sm:$0xff]  ;;  %v383_v36 = vld [vmem:[#allocation7 + $0x8] sm:$0xff]  ;;  %v384_v39 = vld [vmem:[#allocation7 + $0x10] sm:$0xff] }
  0x4e   :  { %985 = vmatprep.subr.bf16.mxu1 %v984_v6  ;;  %v1021_v37 = vpack.c.bf16 %v383_v36, %v382_v35  ;;  %v385_v40 = vld [vmem:[#allocation7 + $0x18] sm:$0xff]  ;;  %v386_v42 = vld [vmem:[#allocation7 + $0x20] sm:$0xff]  ;;  %v387_v43 = vld [vmem:[#allocation7 + $0x28] sm:$0xff] }
  0x4f   :  { %955 = vmatpush1.bf16.msra.mxu0 %v954_v12  ;;  %v1024_v41 = vpack.c.bf16 %v385_v40, %v384_v39  ;;  %v1027_v44 = vpack.c.bf16 %v387_v43, %v386_v42  ;;  %v388_v45 = vld [vmem:[#allocation7 + $0x30] sm:$0xff]  ;;  %v389_v46 = vld [vmem:[#allocation7 + $0x38] sm:$0xff]  ;;  %v390_v48 = vld [vmem:[#allocation7 + $0x40] sm:$0xff] }
  0x50   :  { %957 = vmatprep.subr.bf16.mxu0 %v956_v14  ;;  %v1030_v47 = vpack.c.bf16 %v389_v46, %v388_v45  ;;  %v391_v49 = vld [vmem:[#allocation7 + $0x48] sm:$0xff]  ;;  %v392_v51 = vld [vmem:[#allocation7 + $0x50] sm:$0xff]  ;;  %v393_v52 = vld [vmem:[#allocation7 + $0x58] sm:$0xff] }
  0x51   :  { %987 = vmatpush1.bf16.msra.mxu1 %v986_v13  ;;  %v1033_v50 = vpack.c.bf16 %v391_v49, %v390_v48  ;;  %v1036_v53 = vpack.c.bf16 %v393_v52, %v392_v51  ;;  %v394_v54 = vld [vmem:[#allocation7 + $0x60] sm:$0xff]  ;;  %v395_v55 = vld [vmem:[#allocation7 + $0x68] sm:$0xff]  ;;  %v396_v57 = vld [vmem:[#allocation7 + $0x70] sm:$0xff] }
  0x52   :  { %989 = vmatprep.subr.bf16.mxu1 %v988_v18  ;;  %v1039_v56 = vpack.c.bf16 %v395_v55, %v394_v54  ;;  %v397_v58 = vld [vmem:[#allocation7 + $0x78] sm:$0xff]  ;;  %v59_v60 = vld [vmem:[#allocation5 + $0x20] sm:$0xff]  ;;  %v64_v61 = vld [vmem:[#allocation5 + $0x48] sm:$0xff] }
  0x53   :  { %959 = vmatpush1.bf16.msra.mxu0 %v958_v24  ;;  %v1042_v59 = vpack.c.bf16 %v397_v58, %v396_v57  ;;  %v69_v62 = vld [vmem:[#allocation5 + $0x70] sm:$0xff]  ;;  %v997_v63 = vpack.c.bf16 %v64_v61, %v59_v60  ;;  %v74_v1 = vld [vmem:[#allocation5 + $0x98] sm:$0xff]  ;;  %v79_v3 = vld [vmem:[#allocation5 + $0xc0] sm:$0xff] }
  0x54   :  { %961 = vmatprep.subr.bf16.mxu0 %v960_v26  ;;  %v1000_v2 = vpack.c.bf16 %v74_v1, %v69_v62  ;;  %v84_v4 = vld [vmem:[#allocation5 + $0xe8] sm:$0xff]  ;;  %v89_v6 = vld [vmem:[#allocation5 + $0x110] sm:$0xff]  ;;  %v94_v7 = vld [vmem:[#allocation5 + $0x138] sm:$0xff] }
  0x55   :  { %991 = vmatpush1.bf16.msra.mxu1 %v990_v25  ;;  %v1003_v5 = vpack.c.bf16 %v84_v4, %v79_v3  ;;  %v1006_v8 = vpack.c.bf16 %v94_v7, %v89_v6  ;;  %v99_v9 = vld [vmem:[#allocation5 + $0x160] sm:$0xff]  ;;  %v104_v10 = vld [vmem:[#allocation5 + $0x188] sm:$0xff]  ;;  %v109_v12 = vld [vmem:[#allocation5 + $0x1b0] sm:$0xff] }
  0x56   :  { %993 = vmatprep.subr.bf16.mxu1 %v992_v29  ;;  %v1009_v11 = vpack.c.bf16 %v104_v10, %v99_v9  ;;  %v114_v13 = vld [vmem:[#allocation5 + $0x1d8] sm:$0xff]  ;;  %v717_v15 = vld [vmem:[#allocation7 + $0x181] ss:$0 sm:$0xff]  ;;  %v718_v21 = vld [vmem:[#allocation7 + $0x182] ss:$0 sm:$0xff] }
  0x57   :  { %963 = vmatpush1.bf16.msra.mxu0 %v962_v32  ;;  %v1012_v14 = vpack.c.bf16 %v114_v13, %v109_v12  ;;  %v119_v43 = vld [vmem:[#allocation5 + $0x200] sm:$0xff]  ;;  %v129_v46 = vld [vmem:[#allocation5 + $0x250] sm:$0xff]  ;;  %v504_v61 = vld [vmem:[#allocation7 + $0xc8] sm:$0xff] }
  0x58   :  { %996 = vmatprep.subr.bf16.mxu0 %v1217_v38  ;;  %v495_v49 = vld [vmem:[#allocation7 + $0x80] sm:$0xff]  ;;  %v497_v52 = vld [vmem:[#allocation7 + $0x90] sm:$0xff]  ;;  %v508_v3 = vld [vmem:[#allocation7 + $0xe8] sm:$0xff] }
  0x59   :  { %995 = vmatpush1.bf16.msra.mxu1 %v994_v33  ;;  %v716_v33 = vld [vmem:[#allocation7 + $0x180] ss:$0 sm:$0xff]  ;;  %v501_v58 = vld [vmem:[#allocation7 + $0xb0] sm:$0xff]  ;;  %v510_v6 = vld [vmem:[#allocation7 + $0xf8] sm:$0xff] }
  0x5a   :  { %200 = vmatmul.mubr.f32.vlgmr.msra.gmra.mrb[0].mxu0 %v1278_v34  ;;  %1020 = vmatprep.subr.bf16.mxu1 %v1217_v38  ;;  %v499_v55 = vld [vmem:[#allocation7 + $0xa0] sm:$0xff]  ;;  %v505_v62 = vld [vmem:[#allocation7 + $0xd0] sm:$0xff] }
  0x5b   :  { %824 = vmatprep.mubr.msk.f32.mxu0 %vm1218_vm0, %v1216_v0  ;;  %998 = vmatpush3.bf16.msra.mxu0 %v997_v63  ;;  %v506_v63 = vld [vmem:[#allocation7 + $0xd8] sm:$0xff]  ;;  %v720_v12 = vld [vmem:[#allocation7 + $0x184] ss:$0 sm:$0xff] }
  0x5c   :  { %271 = vmatmul.mubr.f32.vlgmr.msra.gmra.mrb[0].mxu1 %v1278_v34  ;;  %999 = vmatprep.subr.bf16.mxu0 %v1217_v38  ;;  %v1060_v1 = vpack.c.bf16 %v506_v63, %v505_v62 }
  0x5d   :  { %1022 = vmatpush3.bf16.msra.mxu1 %v1021_v37  ;;  %859 = vmatprep.mubr.msk.f32.mxu1 %vm1218_vm0, %v1216_v0 }
  0x5e   :  { %1023 = vmatprep.subr.bf16.mxu1 %v1217_v38 }
  0x5f   :  { %1001 = vmatpush3.bf16.msra.mxu0 %v1000_v2  ;;  %v507_v2 = vld [vmem:[#allocation7 + $0xe0] sm:$0xff] }
  0x60   :  { %1002 = vmatprep.subr.bf16.mxu0 %v1217_v38  ;;  %v1063_v4 = vpack.c.bf16 %v508_v3, %v507_v2 }
  0x61   :  { %1025 = vmatpush3.bf16.msra.mxu1 %v1024_v41 }
  0x62   :  { %1026 = vmatprep.subr.bf16.mxu1 %v1217_v38 }
  0x63   :  { %1004 = vmatpush3.bf16.msra.mxu0 %v1003_v5  ;;  %v509_v5 = vld [vmem:[#allocation7 + $0xf0] sm:$0xff] }
  0x64   :  { %1005 = vmatprep.subr.bf16.mxu0 %v1217_v38  ;;  %v1066_v7 = vpack.c.bf16 %v510_v6, %v509_v5 }
  0x65   :  { %1028 = vmatpush3.bf16.msra.mxu1 %v1027_v44  ;;  %v124_v44 = vld [vmem:[#allocation5 + $0x228] sm:$0xff] }
  0x66   :  { %1029 = vmatprep.subr.bf16.mxu1 %v1217_v38  ;;  %v1015_v45 = vpack.c.bf16 %v124_v44, %v119_v43  ;;  %v615_v43 = vld [vmem:[#allocation7 + $0x138] sm:$0xff] }
  0x67   :  { %1007 = vmatpush3.bf16.msra.mxu0 %v1006_v8  ;;  %v719_v8 = vld [vmem:[#allocation7 + $0x183] ss:$0 sm:$0xff] }
  0x68   :  { %1008 = vmatprep.subr.bf16.mxu0 %v1217_v38 }
  0x69   :  { %1031 = vmatpush3.bf16.msra.mxu1 %v1030_v47  ;;  %v134_v47 = vld [vmem:[#allocation5 + $0x278] sm:$0xff] }
  0x6a   :  { %1032 = vmatprep.subr.bf16.mxu1 %v1217_v38  ;;  %v1018_v48 = vpack.c.bf16 %v134_v47, %v129_v46  ;;  %v617_v46 = vld [vmem:[#allocation7 + $0x148] sm:$0xff] }
  0x6b   :  { %1010 = vmatpush3.bf16.msra.mxu0 %v1009_v11 }
  0x6c   :  { %1011 = vmatprep.subr.bf16.mxu0 %v1217_v38 }
  0x6d   :  { %1034 = vmatpush3.bf16.msra.mxu1 %v1033_v50  ;;  %v496_v50 = vld [vmem:[#allocation7 + $0x88] sm:$0xff] }
  0x6e   :  { %1035 = vmatprep.subr.bf16.mxu1 %v1217_v38  ;;  %v1045_v51 = vpack.c.bf16 %v496_v50, %v495_v49  ;;  %v619_v49 = vld [vmem:[#allocation7 + $0x158] sm:$0xff] }
  0x6f   :  { %1013 = vmatpush3.bf16.msra.mxu0 %v1012_v14 }
  0x70   :  { %1014 = vmatprep.subr.bf16.mxu0 %v1217_v38 }
  0x71   :  { %1037 = vmatpush3.bf16.msra.mxu1 %v1036_v53  ;;  %v498_v53 = vld [vmem:[#allocation7 + $0x98] sm:$0xff] }
  0x72   :  { %1038 = vmatprep.subr.bf16.mxu1 %v1217_v38  ;;  %v1048_v54 = vpack.c.bf16 %v498_v53, %v497_v52  ;;  %v621_v52 = vld [vmem:[#allocation7 + $0x168] sm:$0xff] }
  0x73   :  { %1016 = vmatpush3.bf16.msra.mxu0 %v1015_v45  ;;  %v616_v45 = vld [vmem:[#allocation7 + $0x140] sm:$0xff] }
  0x74   :  { %1017 = vmatprep.subr.bf16.mxu0 %v1217_v38  ;;  %v1081_v47 = vpack.c.bf16 %v617_v46, %v616_v45 }
  0x75   :  { %1040 = vmatpush3.bf16.msra.mxu1 %v1039_v56  ;;  %v500_v56 = vld [vmem:[#allocation7 + $0xa8] sm:$0xff] }
  0x76   :  { %1041 = vmatprep.subr.bf16.mxu1 %v1217_v38  ;;  %v1051_v57 = vpack.c.bf16 %v500_v56, %v499_v55  ;;  %v623_v55 = vld [vmem:[#allocation7 + $0x178] sm:$0xff] }
  0x77   :  { %1019 = vmatpush3.bf16.msra.mxu0 %v1018_v48  ;;  %v618_v48 = vld [vmem:[#allocation7 + $0x150] sm:$0xff] }
  0x78   :  { %1044 = vmatprep.subr.bf16.mxu0 %v1217_v38  ;;  %v1084_v50 = vpack.c.bf16 %v619_v49, %v618_v48 }
  0x79   :  { %1043 = vmatpush3.bf16.msra.mxu1 %v1042_v59  ;;  %v502_v59 = vld [vmem:[#allocation7 + $0xb8] sm:$0xff] }
  0x7a   :  { %1068 = vmatprep.subr.bf16.mxu1 %v1217_v38  ;;  %825 = vmatmul.mubr.f32.vlgmr.msra.gmra.mrb[2].mxu0 %v1278_v34  ;;  %v1054_v60 = vpack.c.bf16 %v502_v59, %v501_v58  ;;  %v503_v34 = vld [vmem:[#allocation7 + $0xc0] sm:$0xff] }
  0x7b   :  { %1046 = vmatpush3.bf16.msra.mxu0 %v1045_v51  ;;  %894 = vmatprep.mubr.msk.f32.mxu0 %vm1218_vm0, %v1216_v0  ;;  %v620_v51 = vld [vmem:[#allocation7 + $0x160] sm:$0xff] }
  0x7c   :  { %1047 = vmatprep.subr.bf16.mxu0 %v1217_v38  ;;  %v1087_v53 = vpack.c.bf16 %v621_v52, %v620_v51 }
  0x7f   :  { %1049 = vmatpush3.bf16.msra.mxu0 %v1048_v54  ;;  %v622_v54 = vld [vmem:[#allocation7 + $0x170] sm:$0xff] }
  0x80   :  { %1050 = vmatprep.subr.bf16.mxu0 %v1217_v38  ;;  %v1090_v56 = vpack.c.bf16 %v623_v55, %v622_v54 }
  0x83   :  { %1052 = vmatpush3.bf16.msra.mxu0 %v1051_v57  ;;  %v721_v57 = vld [vmem:[#allocation7 + $0x185] ss:$0 sm:$0xff] }
  0x84   :  { %1053 = vmatprep.subr.bf16.mxu0 %v1217_v38 }
  0x87   :  { %1055 = vmatpush3.bf16.msra.mxu0 %v1054_v60 }
  0x88   :  { %1056 = vmatprep.subr.bf16.mxu0 %v1217_v38 }
 0x12d   :  { %v201_v16 = vpop.f32.mrb[0].mxu0 }
 0x12e   :  { %v203_v17 = vpop.f32.mrb[1].mxu0  ;;  %v352_v40 = vadd.f32 %v716_v33, %v201_v16 }
 0x12f   :  { %v272_v18 = vpop.f32.mrb[0].mxu1  ;;  %v358_v19 = vadd.f32 %v717_v15, %v203_v17 }
 0x130   :  { %v1302_v20 = vpop.f32.mrb[1].mxu1 }
 0x131   :  { %v359_v22 = vmul.f32 %v358_v19, %v272_v18 }
 0x133   :  { %v365_v23 = vadd.f32 %v718_v21, %v359_v22 }
 0x135   :  { %v367_v24 = vand.u32 2147483647, %v365_v23  ;;  %v366_v37 = vmax.f32 %v365_v23, 0.0 }
 0x137   :  { %v368_v25 = vsub.f32 0.0, %v367_v24 }
 0x139   :  { %v369_v26 = vmul.f32 1.442695, %v368_v25 }
 0x13b   :  { %1103 = vpow2.f32 %v369_v26 }
 0x145   :  { %v1104_v27 = vpop.eup %1103 }
 0x146   :  { %v371_v28 = vadd.f32 1.0, %v1104_v27  ;;  %v374_v29 = vmul.f32 -0.5, %v1104_v27  ;;  %v377_v31 = vand.u32 2147483647, %v1104_v27 }
 0x148   :  { %1105 = vlog2.f32 %v371_v28  ;;  %v375_v30 = vadd.f32 1.0, %v374_v29  ;;  %vm378_vm1 = vcmp.lt.f32.partialorder %v377_v31, 0.0004427343  ;;  %v608_v31 = vld [vmem:[#allocation7 + $0x100] sm:$0xff] }
 0x14a   :  { %v376_v36 = vmul.f32 %v1104_v27, %v375_v30 }
 0x152   :  { %v1106_v32 = vpop.eup %1105 }
 0x153   :  { %v373_v35 = vmul.f32 0.6931472, %v1106_v32  ;;  %v609_v32 = vld [vmem:[#allocation7 + $0x108] sm:$0xff] }
 0x154   :  { %v1069_v33 = vpack.c.bf16 %v609_v32, %v608_v31 }
 0x155   :  { %v379_v39 = vsel %vm378_vm1, %v376_v36, %v373_v35  ;;  %v610_v35 = vld [vmem:[#allocation7 + $0x110] sm:$0xff]  ;;  %v611_v36 = vld [vmem:[#allocation7 + $0x118] sm:$0xff] }
 0x156   :  { %v380_v41 = vadd.f32 %v379_v39, %v366_v37  ;;  %v1072_v37 = vpack.c.bf16 %v611_v36, %v610_v35  ;;  %v612_v39 = vld [vmem:[#allocation7 + $0x120] sm:$0xff] }
 0x158   :  { %v381_v42 = vmul.f32 %v380_v41, %v352_v40  ;;  %v613_v40 = vld [vmem:[#allocation7 + $0x128] sm:$0xff] }
 0x159   :  { %v1075_v41 = vpack.c.bf16 %v613_v40, %v612_v39 }
 0x15a   :  { %860 = vmatmul.mubr.f32.vlgmr.msra.gmra.mrb[2].mxu1 %v381_v42  ;;  %v614_v42 = vld [vmem:[#allocation7 + $0x130] sm:$0xff] }
 0x15b   :  { %929 = vmatprep.mubr.msk.f32.mxu1 %vm1218_vm0, %v1216_v0  ;;  %v1057_v0 = vpack.c.bf16 %v504_v61, %v503_v34  ;;  %1070 = vmatpush3.bf16.msra.mxu1 %v1069_v33  ;;  %v1078_v44 = vpack.c.bf16 %v615_v43, %v614_v42  ;;  %v722_v34 = vld [vmem:[#allocation7 + $0x186] ss:$0 sm:$0xff] }
 0x15c   :  { %1071 = vmatprep.subr.bf16.mxu1 %v1217_v38 }
 0x15d   :  { %1058 = vmatpush3.bf16.msra.mxu0 %v1057_v0 }
 0x15e   :  { %1059 = vmatprep.subr.bf16.mxu0 %v1217_v38 }
 0x15f   :  { %1073 = vmatpush3.bf16.msra.mxu1 %v1072_v37 }
 0x160   :  { %1074 = vmatprep.subr.bf16.mxu1 %v1217_v38 }
 0x161   :  { %1061 = vmatpush3.bf16.msra.mxu0 %v1060_v1 }
 0x162   :  { %1062 = vmatprep.subr.bf16.mxu0 %v1217_v38 }
 0x163   :  { %1076 = vmatpush3.bf16.msra.mxu1 %v1075_v41 }
 0x164   :  { %1077 = vmatprep.subr.bf16.mxu1 %v1217_v38 }
 0x165   :  { %1064 = vmatpush3.bf16.msra.mxu0 %v1063_v4 }
 0x166   :  { %1065 = vmatprep.subr.bf16.mxu0 %v1217_v38 }
 0x167   :  { %1079 = vmatpush3.bf16.msra.mxu1 %v1078_v44 }
 0x168   :  { %1080 = vmatprep.subr.bf16.mxu1 %v1217_v38 }
 0x169   :  { %1067 = vmatpush3.bf16.msra.mxu0 %v1066_v7 }
 0x16b   :  { %1082 = vmatpush3.bf16.msra.mxu1 %v1081_v47 }
 0x16c   :  { %1083 = vmatprep.subr.bf16.mxu1 %v1217_v38 }
 0x16f   :  { %1085 = vmatpush3.bf16.msra.mxu1 %v1084_v50 }
 0x170   :  { %1086 = vmatprep.subr.bf16.mxu1 %v1217_v38 }
 0x173   :  { %1088 = vmatpush3.bf16.msra.mxu1 %v1087_v53 }
 0x174   :  { %1089 = vmatprep.subr.bf16.mxu1 %v1217_v38 }
 0x177   :  { %1091 = vmatpush3.bf16.msra.mxu1 %v1090_v56 }
 0x22d   :  { %v469_v9 = vpop.f32.mrb[2].mxu1 }
 0x22e   :  { %v470_v10 = vadd.f32 %v719_v8, %v469_v9  ;;  %v861_v11 = vpop.f32.mrb[3].mxu1 }
 0x230   :  { %v473_v13 = vmul.f32 %v470_v10, %v1302_v20  ;;  %v343_v20 = vpop.f32.mrb[2].mxu0 }
 0x231   :  { %v826_v30 = vpop.f32.mrb[3].mxu0 }
 0x232   :  { %v479_v14 = vadd.f32 %v720_v12, %v473_v13  ;;  %v723_v12 = vld [vmem:[#allocation7 + $0x187] ss:$0 sm:$0xff] }
 0x234   :  { %v481_v15 = vand.u32 2147483647, %v479_v14  ;;  %v480_v27 = vmax.f32 %v479_v14, 0.0 }
 0x236   :  { %v482_v16 = vsub.f32 0.0, %v481_v15 }
 0x238   :  { %v483_v17 = vmul.f32 1.442695, %v482_v16 }
 0x23a   :  { %1107 = vpow2.f32 %v483_v17 }
 0x244   :  { %v1108_v18 = vpop.eup %1107 }
 0x245   :  { %v485_v19 = vadd.f32 1.0, %v1108_v18  ;;  %v488_v21 = vmul.f32 -0.5, %v1108_v18  ;;  %v491_v23 = vand.u32 2147483647, %v1108_v18 }
 0x247   :  { %1109 = vlog2.f32 %v485_v19  ;;  %v489_v22 = vadd.f32 1.0, %v488_v21  ;;  %vm492_vm2 = vcmp.lt.f32.partialorder %v491_v23, 0.0004427343 }
 0x249   :  { %v490_v26 = vmul.f32 %v1108_v18, %v489_v22 }
 0x251   :  { %v1110_v24 = vpop.eup %1109 }
 0x252   :  { %v487_v25 = vmul.f32 0.6931472, %v1110_v24 }
 0x254   :  { %v493_v28 = vsel %vm492_vm2, %v490_v26, %v487_v25 }
 0x255   :  { %v494_v29 = vadd.f32 %v493_v28, %v480_v27 }
 0x257   :  { %895 = vmatmul.mubr.f32.vlgmr.msra.gmra.mrb[4].mxu0 %v494_v29 }
 0x32a   :  { %v582_v58 = vpop.f32.mrb[4].mxu0 }
 0x32b   :  { %v583_v59 = vadd.f32 %v721_v57, %v582_v58  ;;  %v896_v60 = vpop.f32.mrb[5].mxu0 }
 0x32d   :  { %v586_v61 = vmul.f32 %v583_v59, %v343_v20 }
 0x32f   :  { %v592_v0 = vadd.f32 %v722_v34, %v586_v61 }
 0x331   :  { %v594_v62 = vand.u32 2147483647, %v592_v0  ;;  %v593_v9 = vmax.f32 %v592_v0, 0.0 }
 0x333   :  { %v595_v63 = vsub.f32 0.0, %v594_v62 }
 0x335   :  { %v596_v1 = vmul.f32 1.442695, %v595_v63 }
 0x337   :  { %1111 = vpow2.f32 %v596_v1 }
 0x341   :  { %v1112_v2 = vpop.eup %1111 }
 0x342   :  { %v598_v3 = vadd.f32 1.0, %v1112_v2  ;;  %v601_v4 = vmul.f32 -0.5, %v1112_v2  ;;  %v604_v6 = vand.u32 2147483647, %v1112_v2 }
 0x344   :  { %1113 = vlog2.f32 %v598_v3  ;;  %v602_v5 = vadd.f32 1.0, %v601_v4  ;;  %vm605_vm3 = vcmp.lt.f32.partialorder %v604_v6, 0.0004427343 }
 0x346   :  { %v603_v8 = vmul.f32 %v1112_v2, %v602_v5 }
 0x34e   :  { %v1114_v7 = vpop.eup %1113 }
 0x34f   :  { %v600_v38 = vmul.f32 0.6931472, %v1114_v7 }
 0x351   :  { %v606_v10 = vsel %vm605_vm3, %v603_v8, %v600_v38 }
 0x352   :  { %v607_v11 = vadd.f32 %v606_v10, %v593_v9 }
 0x354   :  { %930 = vmatmul.mubr.f32.vlgmr.msra.gmra.mrb[4].mxu1 %v607_v11 }
 0x427   :  { %v695_v13 = vpop.f32.mrb[4].mxu1 }
 0x428   :  { %v696_v14 = vadd.f32 %v723_v12, %v695_v13  ;;  %v931_v15 = vpop.f32.mrb[5].mxu1 }
 0x42a   :  { %699 = vst [vmem:[#allocation8] sm:$0xff] %v696_v14 }
 0x42b   :  { %1192 = shalt.err (!%p1189_p0)
}
 0x42c   :  { %s1193_s27 = scalar_lea.hbm %s1341_s3, 128 }
 0x42d   :  { %p1194_p1 = scmp.ne.s32.totalorder %s1341_s3, %s1193_s27  ;;  %p1197_p2 = scmp.lt.u32.totalorder %s1193_s27, %s1341_s3 }
 0x42f   :  { %p1199_p3 = pnand %p1197_p2, %p1194_p1 }
 0x431   :  { %1202 = shalt.err (!%p1199_p3)
}
 0x432   :  { %709 = dma.vmem_to_hbm [thread:$0]  %s707_s23, 128, %s1341_s3, [#allocation4]  }
 0x433   :  { %1207 = dma.done.wait [#allocation4], 128  }
 0x434   :  { %1208 = vsyncadd [#allocation4], 4294967168 }
 0x435   :  { %713 = vsyncpa [#allocation3], 1 }
 0x436   :  { %714 = vsyncpa [#allocation6], 1 }
 0x437   :  { %715 = vsyncpa [#allocation4], 1 }

</bundles_post_ra>
